<compile_context>
chip_gen: v7x
topology: tpu7x:2x2x1
jax: 0.10.0
libtpu: 0.0.40
codegen_flags: <defaults>
</compile_context>

<pallas_src>
import jax
import jax.numpy as jnp
from jax.experimental import pallas as pl
from jax.experimental.pallas import tpu as pltpu

_NEG_SLOPE = 0.01  # PyTorch nn.LeakyReLU default negative_slope
_BN_EPS = 1e-5     # PyTorch nn.BatchNorm1d default eps


def _relation_meta_kernel(x_ref, w1_ref, w2_ref, w3_ref,
                          s1_ref, t1_ref, s2_ref, t2_ref, s3_ref, t3_ref,
                          o_ref):
    # x_ref : (few, Din)   one task's support set (leading batch dim squeezed)
    # wK_ref: (in, out)    layer-K weight (already transposed vs. PyTorch)
    # sK_ref: (few, 1)     folded BN scale   gamma/sqrt(var+eps)
    # tK_ref: (few, out)   folded bias+BN shift
    # o_ref : (1, out_size)
    x = x_ref[...].astype(jnp.float32)

    # ---- fc1 + (bias + eval-BN folded) + LeakyReLU ----
    h = jnp.dot(x, w1_ref[...], preferred_element_type=jnp.float32)
    h = h * s1_ref[...] + t1_ref[...]
    h = jnp.where(h >= 0, h, _NEG_SLOPE * h)

    # ---- fc2 + (bias + eval-BN folded) + LeakyReLU ----
    h = jnp.dot(h, w2_ref[...], preferred_element_type=jnp.float32)
    h = h * s2_ref[...] + t2_ref[...]
    h = jnp.where(h >= 0, h, _NEG_SLOPE * h)

    # ---- fc3 + (bias + eval-BN folded) ----
    h = jnp.dot(h, w3_ref[...], preferred_element_type=jnp.float32)
    h = h * s3_ref[...] + t3_ref[...]

    # ---- mean over the `few` axis -> (1, out_size) ----
    o_ref[...] = jnp.mean(h, axis=0, keepdims=True).astype(o_ref.dtype)


def _fold_bias_bn(bias, gamma, beta, mean, var, eps=_BN_EPS):
    """Fold Linear bias + eval-mode BatchNorm1d(few) into (scale, shift).

    bias: (H,)  gamma/beta/mean/var: (few,)
    Returns scale (few, 1), shift (few, H) such that
      BN(z + bias) = z * scale + shift   (z = x @ W, per f-channel / h-unit).
    """
    inv = (gamma / jnp.sqrt(var + eps)).astype(jnp.float32)          # (few,)
    scale = inv[:, None]                                             # (few, 1)
    shift = (bias[None, :] - mean[:, None]) * inv[:, None] + beta[:, None]
    return scale, shift.astype(jnp.float32)


def relation_meta_learner(inputs, params):
    """Inference forward of RelationMetaLearner.

    inputs: (B, few, ...) — trailing dims are flattened to 2*embed_size.
    params: dict with, per layer k in {1,2,3}:
        'wK'  (in, out)  weight (transpose of PyTorch's (out, in) layout)
        'bK'  (out,)     linear bias
        'gK','betaK','muK','varK' (few,)  BatchNorm1d(few) params / running stats
    Returns (B, 1, 1, out_size), matching the PyTorch module.
    """
    B, few = inputs.shape[0], inputs.shape[1]
    x = inputs.reshape(B, few, -1)
    din = x.shape[-1]

    w1, w2, w3 = params['w1'], params['w2'], params['w3']
    h1, h2, out_size = w1.shape[1], w2.shape[1], w3.shape[1]

    s1, t1 = _fold_bias_bn(params['b1'], params['g1'], params['beta1'],
                           params['mu1'], params['var1'])
    s2, t2 = _fold_bias_bn(params['b2'], params['g2'], params['beta2'],
                           params['mu2'], params['var2'])
    s3, t3 = _fold_bias_bn(params['b3'], params['g3'], params['beta3'],
                           params['mu3'], params['var3'])

    const_spec = lambda shape: pl.BlockSpec(shape, lambda i: (0, 0))

    out = pl.pallas_call(
        _relation_meta_kernel,
        out_shape=jax.ShapeDtypeStruct((B, 1, out_size), x.dtype),
        grid=(B,),
        in_specs=[
            pl.BlockSpec((None, few, din), lambda i: (i, 0, 0)),  # x: one task/step
            const_spec((din, h1)),
            const_spec((h1, h2)),
            const_spec((h2, out_size)),
            const_spec((few, 1)), const_spec((few, h1)),
            const_spec((few, 1)), const_spec((few, h2)),
            const_spec((few, 1)), const_spec((few, out_size)),
        ],
        out_specs=pl.BlockSpec((None, 1, out_size), lambda i: (i, 0, 0)),
        compiler_params=pltpu.CompilerParams(
            dimension_semantics=("parallel",)),
    )(x, w1, w2, w3, s1, t1, s2, t2, s3, t3)

    return out.reshape(B, 1, 1, out_size)


def _reference(inputs, params, eps=_BN_EPS):
    """Pure-JAX reference of the eval-mode PyTorch forward (unfolded BN)."""
    B, few = inputs.shape[0], inputs.shape[1]
    x = inputs.reshape(B, few, -1).astype(jnp.float32)

    def layer(h, w, b, g, beta, mu, var, act):
        h = jnp.einsum('bfd,dh->bfh', h, w) + b[None, None, :]
        h = (h - mu[None, :, None]) / jnp.sqrt(var[None, :, None] + eps)
        h = h * g[None, :, None] + beta[None, :, None]
        if act:
            h = jnp.where(h >= 0, h, _NEG_SLOPE * h)
        return h

    h = layer(x, params['w1'], params['b1'], params['g1'], params['beta1'],
              params['mu1'], params['var1'], True)
    h = layer(h, params['w2'], params['b2'], params['g2'], params['beta2'],
              params['mu2'], params['var2'], True)
    h = layer(h, params['w3'], params['b3'], params['g3'], params['beta3'],
              params['mu3'], params['var3'], False)
    return jnp.mean(h, axis=1).reshape(B, 1, 1, -1)


if __name__ == "__main__":
    key = jax.random.PRNGKey(0)
    keys = jax.random.split(key, 20)

    # Small shapes consistent with the module: inputs are (B, few, 2, embed)
    # head/tail embedding pairs; forward flattens them to (B, few, 2*embed).
    B, few, embed = 2, 4, 16
    din, h1, h2, out_size = 2 * embed, 64, 32, 16

    x = jax.random.normal(keys[0], (B, few, 2, embed), dtype=jnp.float32)

    def xavier(k, fan_in, fan_out):
        std = (2.0 / (fan_in + fan_out)) ** 0.5
        return std * jax.random.normal(k, (fan_in, fan_out), dtype=jnp.float32)

    def bn(k):  # gamma, beta, running_mean, running_var (non-trivial values)
        k1, k2, k3, k4 = jax.random.split(k, 4)
        return (jax.random.uniform(k1, (few,), minval=0.5, maxval=1.5),
                0.1 * jax.random.normal(k2, (few,)),
                0.1 * jax.random.normal(k3, (few,)),
                jax.random.uniform(k4, (few,), minval=0.5, maxval=1.5))

    g1, beta1, mu1, var1 = bn(keys[4])
    g2, beta2, mu2, var2 = bn(keys[5])
    g3, beta3, mu3, var3 = bn(keys[6])

    params = dict(
        w1=xavier(keys[1], din, h1),
        w2=xavier(keys[2], h1, h2),
        w3=xavier(keys[3], h2, out_size),
        b1=jax.random.uniform(keys[7], (h1,), minval=-0.1, maxval=0.1),
        b2=jax.random.uniform(keys[8], (h2,), minval=-0.1, maxval=0.1),
        b3=jax.random.uniform(keys[9], (out_size,), minval=-0.1, maxval=0.1),
        g1=g1, beta1=beta1, mu1=mu1, var1=var1,
        g2=g2, beta2=beta2, mu2=mu2, var2=var2,
        g3=g3, beta3=beta3, mu3=mu3, var3=var3,
    )

    out = relation_meta_learner(x, params)
    jax.block_until_ready(out)

    ref = _reference(x, params)
    assert out.shape == (B, 1, 1, out_size), out.shape
    assert jnp.allclose(out, ref, atol=1e-4, rtol=1e-4), "mismatch vs reference"

    print("KERNEL_OK")
</pallas_src>

<mosaic_0001>
module attributes {stable_mosaic.version = 11 : i64} {
  func.func @_relation_meta_kernel(%arg0: i32, %arg1: memref<1x4x32xf32, #tpu.memory_space<vmem>>, %arg2: memref<32x64xf32, #tpu.memory_space<vmem>>, %arg3: memref<64x32xf32, #tpu.memory_space<vmem>>, %arg4: memref<32x16xf32, #tpu.memory_space<vmem>>, %arg5: memref<4x1xf32, #tpu.memory_space<vmem>>, %arg6: memref<4x64xf32, #tpu.memory_space<vmem>>, %arg7: memref<4x1xf32, #tpu.memory_space<vmem>>, %arg8: memref<4x32xf32, #tpu.memory_space<vmem>>, %arg9: memref<4x1xf32, #tpu.memory_space<vmem>>, %arg10: memref<4x16xf32, #tpu.memory_space<vmem>>, %arg11: memref<1x1x16xf32, #tpu.memory_space<vmem>>) attributes {dimension_semantics = [#tpu.dimension_semantics<parallel>], iteration_bounds = array<i64: 2>, scalar_prefetch = 0 : i64, scratch_operands = 0 : i64, tpu.core_type = #tpu.core_type<tc>, window_params = [{transform_indices = @transform_0, window_bounds = array<i64: 1, 4, 32>}, {pipeline_mode = #tpu.pipeline_mode<synchronous>, transform_indices = @transform_1, window_bounds = array<i64: 32, 64>}, {pipeline_mode = #tpu.pipeline_mode<synchronous>, transform_indices = @transform_2, window_bounds = array<i64: 64, 32>}, {pipeline_mode = #tpu.pipeline_mode<synchronous>, transform_indices = @transform_3, window_bounds = array<i64: 32, 16>}, {pipeline_mode = #tpu.pipeline_mode<synchronous>, transform_indices = @transform_4, window_bounds = array<i64: 4, 1>}, {pipeline_mode = #tpu.pipeline_mode<synchronous>, transform_indices = @transform_5, window_bounds = array<i64: 4, 64>}, {pipeline_mode = #tpu.pipeline_mode<synchronous>, transform_indices = @transform_6, window_bounds = array<i64: 4, 1>}, {pipeline_mode = #tpu.pipeline_mode<synchronous>, transform_indices = @transform_7, window_bounds = array<i64: 4, 32>}, {pipeline_mode = #tpu.pipeline_mode<synchronous>, transform_indices = @transform_8, window_bounds = array<i64: 4, 1>}, {pipeline_mode = #tpu.pipeline_mode<synchronous>, transform_indices = @transform_9, window_bounds = array<i64: 4, 16>}, {transform_indices = @transform_10, window_bounds = array<i64: 1, 1, 16>}]} {
    %c0 = arith.constant 0 : index
    %c0_0 = arith.constant 0 : index
    %c0_1 = arith.constant 0 : index
    %0 = vector.load %arg1[%c0, %c0_0, %c0_1] : memref<1x4x32xf32, #tpu.memory_space<vmem>>, vector<1x4x32xf32>
    %1 = vector.shape_cast %0 : vector<1x4x32xf32> to vector<4x32xf32>
    %c0_2 = arith.constant 0 : index
    %c0_3 = arith.constant 0 : index
    %2 = vector.load %arg2[%c0_2, %c0_3] : memref<32x64xf32, #tpu.memory_space<vmem>>, vector<32x64xf32>
    %cst = arith.constant dense<0.000000e+00> : vector<4x64xf32>
    %3 = tpu.matmul %1, %2, %cst {dimension_numbers = #tpu.dot_dimension_numbers<[1], [0], [0], [1], [0, 0, 1, 1], [], []>} : vector<4x32xf32>, vector<32x64xf32>, vector<4x64xf32> -> vector<4x64xf32>
    %c0_4 = arith.constant 0 : index
    %c0_5 = arith.constant 0 : index
    %4 = vector.load %arg5[%c0_4, %c0_5] : memref<4x1xf32, #tpu.memory_space<vmem>>, vector<4x1xf32>
    %5 = vector.broadcast %4 : vector<4x1xf32> to vector<4x64xf32>
    %6 = arith.mulf %3, %5 : vector<4x64xf32>
    %c0_6 = arith.constant 0 : index
    %c0_7 = arith.constant 0 : index
    %7 = vector.load %arg6[%c0_6, %c0_7] : memref<4x64xf32, #tpu.memory_space<vmem>>, vector<4x64xf32>
    %8 = arith.addf %6, %7 : vector<4x64xf32>
    %cst_8 = arith.constant 0.000000e+00 : f32
    %9 = vector.broadcast %cst_8 : f32 to vector<4x64xf32>
    %10 = arith.cmpf oge, %8, %9 : vector<4x64xf32>
    %cst_9 = arith.constant 0.00999999977 : f32
    %11 = vector.broadcast %cst_9 : f32 to vector<4x64xf32>
    %12 = arith.mulf %11, %8 : vector<4x64xf32>
    %13 = arith.select %10, %8, %12 : vector<4x64xi1>, vector<4x64xf32>
    %c0_10 = arith.constant 0 : index
    %c0_11 = arith.constant 0 : index
    %14 = vector.load %arg3[%c0_10, %c0_11] : memref<64x32xf32, #tpu.memory_space<vmem>>, vector<64x32xf32>
    %cst_12 = arith.constant dense<0.000000e+00> : vector<4x32xf32>
    %15 = tpu.matmul %13, %14, %cst_12 {dimension_numbers = #tpu.dot_dimension_numbers<[1], [0], [0], [1], [0, 0, 1, 1], [], []>} : vector<4x64xf32>, vector<64x32xf32>, vector<4x32xf32> -> vector<4x32xf32>
    %c0_13 = arith.constant 0 : index
    %c0_14 = arith.constant 0 : index
    %16 = vector.load %arg7[%c0_13, %c0_14] : memref<4x1xf32, #tpu.memory_space<vmem>>, vector<4x1xf32>
    %17 = vector.broadcast %16 : vector<4x1xf32> to vector<4x32xf32>
    %18 = arith.mulf %15, %17 : vector<4x32xf32>
    %c0_15 = arith.constant 0 : index
    %c0_16 = arith.constant 0 : index
    %19 = vector.load %arg8[%c0_15, %c0_16] : memref<4x32xf32, #tpu.memory_space<vmem>>, vector<4x32xf32>
    %20 = arith.addf %18, %19 : vector<4x32xf32>
    %cst_17 = arith.constant 0.000000e+00 : f32
    %21 = vector.broadcast %cst_17 : f32 to vector<4x32xf32>
    %22 = arith.cmpf oge, %20, %21 : vector<4x32xf32>
    %cst_18 = arith.constant 0.00999999977 : f32
    %23 = vector.broadcast %cst_18 : f32 to vector<4x32xf32>
    %24 = arith.mulf %23, %20 : vector<4x32xf32>
    %25 = arith.select %22, %20, %24 : vector<4x32xi1>, vector<4x32xf32>
    %c0_19 = arith.constant 0 : index
    %c0_20 = arith.constant 0 : index
    %26 = vector.load %arg4[%c0_19, %c0_20] : memref<32x16xf32, #tpu.memory_space<vmem>>, vector<32x16xf32>
    %cst_21 = arith.constant dense<0.000000e+00> : vector<4x16xf32>
    %27 = tpu.matmul %25, %26, %cst_21 {dimension_numbers = #tpu.dot_dimension_numbers<[1], [0], [0], [1], [0, 0, 1, 1], [], []>} : vector<4x32xf32>, vector<32x16xf32>, vector<4x16xf32> -> vector<4x16xf32>
    %c0_22 = arith.constant 0 : index
    %c0_23 = arith.constant 0 : index
    %28 = vector.load %arg9[%c0_22, %c0_23] : memref<4x1xf32, #tpu.memory_space<vmem>>, vector<4x1xf32>
    %29 = vector.broadcast %28 : vector<4x1xf32> to vector<4x16xf32>
    %30 = arith.mulf %27, %29 : vector<4x16xf32>
    %c0_24 = arith.constant 0 : index
    %c0_25 = arith.constant 0 : index
    %31 = vector.load %arg10[%c0_24, %c0_25] : memref<4x16xf32, #tpu.memory_space<vmem>>, vector<4x16xf32>
    %32 = arith.addf %30, %31 : vector<4x16xf32>
    %cst_26 = arith.constant dense<0.000000e+00> : vector<16xf32>
    %33 = vector.multi_reduction <add>, %32, %cst_26 [0] : vector<4x16xf32> to vector<16xf32>
    %34 = vector.shape_cast %33 : vector<16xf32> to vector<1x16xf32>
    %cst_27 = arith.constant 4.000000e+00 : f32
    %35 = vector.broadcast %cst_27 : f32 to vector<1x16xf32>
    %36 = arith.divf %34, %35 : vector<1x16xf32>
    %c0_28 = arith.constant 0 : index
    %c0_29 = arith.constant 0 : index
    %c0_30 = arith.constant 0 : index
    %37 = vector.load %arg11[%c0_28, %c0_29, %c0_30] : memref<1x1x16xf32, #tpu.memory_space<vmem>>, vector<1x1x16xf32>
    %38 = vector.shape_cast %37 : vector<1x1x16xf32> to vector<1x16xf32>
    %39 = vector.shape_cast %36 : vector<1x16xf32> to vector<1x1x16xf32>
    tpu.vector_store %arg11[%c0_28, %c0_29, %c0_30], %39 {strides = array<i32>} : memref<1x1x16xf32, #tpu.memory_space<vmem>>, vector<1x1x16xf32>,
    return
  }
  func.func @transform_0(%arg0: i32) -> (i32, i32, i32) {
    %c0_i32 = arith.constant 0 : i32
    %c0_i32_0 = arith.constant 0 : i32
    %c0_i32_1 = arith.constant 0 : i32
    return %arg0, %c0_i32, %c0_i32_0 : i32, i32, i32
  }
  func.func @transform_1(%arg0: i32) -> (i32, i32) {
    %c0_i32 = arith.constant 0 : i32
    %c0_i32_0 = arith.constant 0 : i32
    %c0_i32_1 = arith.constant 0 : i32
    return %c0_i32, %c0_i32_0 : i32, i32
  }
  func.func @transform_2(%arg0: i32) -> (i32, i32) {
    %c0_i32 = arith.constant 0 : i32
    %c0_i32_0 = arith.constant 0 : i32
    %c0_i32_1 = arith.constant 0 : i32
    return %c0_i32, %c0_i32_0 : i32, i32
  }
  func.func @transform_3(%arg0: i32) -> (i32, i32) {
    %c0_i32 = arith.constant 0 : i32
    %c0_i32_0 = arith.constant 0 : i32
    %c0_i32_1 = arith.constant 0 : i32
    return %c0_i32, %c0_i32_0 : i32, i32
  }
  func.func @transform_4(%arg0: i32) -> (i32, i32) {
    %c0_i32 = arith.constant 0 : i32
    %c0_i32_0 = arith.constant 0 : i32
    %c0_i32_1 = arith.constant 0 : i32
    return %c0_i32, %c0_i32_0 : i32, i32
  }
  func.func @transform_5(%arg0: i32) -> (i32, i32) {
    %c0_i32 = arith.constant 0 : i32
    %c0_i32_0 = arith.constant 0 : i32
    %c0_i32_1 = arith.constant 0 : i32
    return %c0_i32, %c0_i32_0 : i32, i32
  }
  func.func @transform_6(%arg0: i32) -> (i32, i32) {
    %c0_i32 = arith.constant 0 : i32
    %c0_i32_0 = arith.constant 0 : i32
    %c0_i32_1 = arith.constant 0 : i32
    return %c0_i32, %c0_i32_0 : i32, i32
  }
  func.func @transform_7(%arg0: i32) -> (i32, i32) {
    %c0_i32 = arith.constant 0 : i32
    %c0_i32_0 = arith.constant 0 : i32
    %c0_i32_1 = arith.constant 0 : i32
    return %c0_i32, %c0_i32_0 : i32, i32
  }
  func.func @transform_8(%arg0: i32) -> (i32, i32) {
    %c0_i32 = arith.constant 0 : i32
    %c0_i32_0 = arith.constant 0 : i32
    %c0_i32_1 = arith.constant 0 : i32
    return %c0_i32, %c0_i32_0 : i32, i32
  }
  func.func @transform_9(%arg0: i32) -> (i32, i32) {
    %c0_i32 = arith.constant 0 : i32
    %c0_i32_0 = arith.constant 0 : i32
    %c0_i32_1 = arith.constant 0 : i32
    return %c0_i32, %c0_i32_0 : i32, i32
  }
  func.func @transform_10(%arg0: i32) -> (i32, i32, i32) {
    %c0_i32 = arith.constant 0 : i32
    %c0_i32_0 = arith.constant 0 : i32
    %c0_i32_1 = arith.constant 0 : i32
    return %arg0, %c0_i32, %c0_i32_0 : i32, i32, i32
  }
}

</mosaic_0001>

<bundles_post_ra>
// kernel: tpu_custom_call.1
= control target key start
LH: loop header
LB: loop body
LE: loop exit
PB: predicated region body
PF: predicated region fallthrough
CT: control target
= control target key end

     0   :  { %15 = vsyncpa [#allocation3], 0  ;;  %s1140_s0 = inlined_call_operand.vmem [shape: f32[2,4,32], index: 0, kind: input, shape index: {}]   ;;  %s1141_s1 = inlined_call_operand.vmem [shape: f32[32,64], index: 1, kind: input, shape index: {}]   ;;  %s1142_s2 = inlined_call_operand.vmem [shape: f32[64,32], index: 2, kind: input, shape index: {}]   ;;  %s1143_s3 = inlined_call_operand.vmem [shape: f32[32,16], index: 3, kind: input, shape index: {}]   ;;  %s1144_s4 = inlined_call_operand.vmem [shape: f32[4,1], index: 4, kind: input, shape index: {}]   ;;  %s1145_s5 = inlined_call_operand.vmem [shape: f32[4,64], index: 5, kind: input, shape index: {}]   ;;  %s1146_s6 = inlined_call_operand.vmem [shape: f32[4,1], index: 6, kind: input, shape index: {}]   ;;  %s1147_s7 = inlined_call_operand.vmem [shape: f32[4,32], index: 7, kind: input, shape index: {}]   ;;  %s1148_s8 = inlined_call_operand.vmem [shape: f32[4,1], index: 8, kind: input, shape index: {}]   ;;  %s1149_s9 = inlined_call_operand.vmem [shape: f32[4,16], index: 9, kind: input, shape index: {}]   ;;  %s1150_s10 = inlined_call_operand.hbm [shape: f32[2,1,16], index: 10, kind: output, shape index: {}]  }
   0x1   :  { %17 = vsyncpa [#allocation3 + $0x1], 0  ;;  %s969_s13 = smov 0   ;;  %s971_s14 = smov 0  }
   0x2   :  { %s973_s15 = smov 0   ;;  %s975_s16 = smov 0  }
   0x3 LB: > { %s990_s17 = sadd.s32 4294967295, %s907_s16   ;;  %s705_s18 = sadd.s32 4294967294, %s907_s16   ;;  %s907_s16 = sphi %s975_s16, %s1156_s16   ;;  %s903_s15 = sphi %s973_s15, %s1155_s15   ;;  %s899_s14 = sphi %s971_s14, %s1154_s14   ;;  %s895_s13 = sphi %s969_s13, %s1153_s13  }
   0x4   : > { %s994_s19 = sadd.s32 1, %s907_s16   ;;  %s245_s20 = sadd.s32 1, %s903_s15 }
   0x5   : > { %s242_s21 = ssub.s32 %s907_s16, %s994_s19  ;;  %p255_p0 = scmp.ne.s32.totalorder %s903_s15, %s899_s14 }
   0x6   : > { %p243_p1 = scmp.eq.s32.totalorder %s242_s21, 0  ;;  %p256_p2 = scmp.eq.s32.totalorder %s990_s17, 1 }
   0x7   : > { %p261_p3 = scmp.ne.s32.totalorder %s899_s14, %s895_s13  ;;  %p262_p4 = scmp.eq.s32.totalorder %s705_s18, 1 }
   0x8   : > { %s1005_s22 = scalar_select %p243_p1, %s903_s15, %s245_s20  }
   0x9   : > { %p1007_p5 = por %p256_p2, %p255_p0  ;;  %p1011_p6 = por %p262_p4, %p261_p3 }
   0xa   : > { %p708_p7 = scmp.ge.s32.totalorder %s907_s16, 1  ;;  %p314_p8 = scmp.lt.s32.totalorder %s907_s16, 3 }
   0xc   : > { %p315_p9 = pnand %p708_p7, %p314_p8 }
   0xd   : > { %v355_v0 = vld [vmem:[%s1141_s1] sm:$0xff] (!%p315_p9)  ;;  %v356_v1 = vld [vmem:[%s1141_s1 + $0x8] sm:$0xff] (!%p315_p9)  ;;  %v357_v2 = vld [vmem:[%s1141_s1 + $0x10] sm:$0xff] (!%p315_p9)  ;;  %v909_v3 = vmov (!%p315_p9), 0.0|0.0   ;;  %vm910_vm0 = vmmov (!%p315_p9), 0   ;;  %v911_v6 = vmov (!%p315_p9), 0.0  }
   0xe   : > { %318 = sbr.rel (%p315_p9) target bundleno = 709 (0x2c5), region = 60  ;;  %776 = vmatprep.subr.bf16.mxu0 (!%p315_p9), %v909_v3  ;;  %v777_v4 = vpack.c.bf16 (!%p315_p9), %v356_v1, %v355_v0  ;;  %v358_v5 = vld [vmem:[%s1141_s1 + $0x18] sm:$0xff] (!%p315_p9)  ;;  %743 = vmatprep.mubr.msk.f32.mxu0 (!%p315_p9), %vm910_vm0, %v911_v6  ;;  %p350_p10 = scmp.lt.s32.totalorder (!%p315_p9), %s990_s17, 1  ;;  %v433_v7 = vld [vmem:[%s1144_s4] sm:$0xf] (!%p315_p9)  ;;  %v912_v8 = vmov (!%p315_p9), 0  }
   0xf   : > { %843 = vset.pattern.permute.xlu0 (!%p315_p9), %v912_v8  ;;  %782 = vmatprep.subr.bf16.mxu1 (!%p315_p9), %v909_v3  ;;  %v445_v9 = vld [vmem:[%s1142_s2] sm:$0xff] (!%p315_p9)  ;;  %v446_v10 = vld [vmem:[%s1142_s2 + $0x8] sm:$0xff] (!%p315_p9)  ;;  %v780_v11 = vpack.c.bf16 (!%p315_p9), %v358_v5, %v357_v2  ;;  %v447_v13 = vld [vmem:[%s1142_s2 + $0x10] sm:$0xff] (!%p315_p9)  ;;  %vm359_vm1 = vcmask (!%p315_p9), 261120   ;;  %vm453_vm3 = vcmask (!%p315_p9), 523264   ;;  %vm625_vm5 = vcmask (!%p315_p9), 125952  }
  0x10   : > { %778 = vmatpush3.bf16.msra.mxu0 (!%p315_p9), %v777_v4  ;;  %436 = vperm.xlu0 (!%p315_p9), %843, %v433_v7   ;;  %v783_v12 = vpack.c.bf16 (!%p315_p9), %v446_v10, %v445_v9  ;;  %v448_v14 = vld [vmem:[%s1142_s2 + $0x18] sm:$0xff] (!%p315_p9)  ;;  %v527_v15 = vld [vmem:[%s1146_s6] sm:$0xf] (!%p315_p9)  ;;  %v450_v19 = vld [vmem:[%s1142_s2 + $0x28] sm:$0xff] (!%p315_p9)  ;;  %s348_s30 = sand.u32 (!%p315_p9), 1, %s899_s14   ;;  %s713_s11 = sshll.u32 (!%p315_p9), %s990_s17, 4 }
  0x11   : > { %779 = vmatprep.subr.bf16.mxu0 (!%p315_p9), %v909_v3  ;;  %762 = vmatprep.mubr.msk.f32.mxu1 (!%p315_p9), %vm910_vm0, %v911_v6  ;;  %v786_v16 = vpack.c.bf16 (!%p315_p9), %v448_v14, %v447_v13  ;;  %v449_v18 = vld [vmem:[%s1142_s2 + $0x20] sm:$0xff] (!%p315_p9)  ;;  %v451_v21 = vld [vmem:[%s1142_s2 + $0x30] sm:$0xff] (!%p315_p9)  ;;  %v452_v22 = vld [vmem:[%s1142_s2 + $0x38] sm:$0xff] (!%p315_p9)  ;;  %s349_s12 = scalar_lea.vmem (!%p315_p9), [#allocation2], %s348_s30  ;;  %vm635_vm6 = vcmask (!%p315_p9), 122880   ;;  %s1098_s25 = scalar_lea.hbm (!%p315_p9), %s1150_s10, %s713_s11 }
  0x12   : > { %784 = vmatpush3.bf16.msra.mxu1 (!%p315_p9), %v783_v12  ;;  %844 = vset.pattern.permute.xlu1 (!%p315_p9), %v912_v8  ;;  %v789_v20 = vpack.c.bf16 (!%p315_p9), %v450_v19, %v449_v18  ;;  %v792_v23 = vpack.c.bf16 (!%p315_p9), %v452_v22, %v451_v21  ;;  %v440_v26 = vld [vmem:[%s1145_s5] sm:$0xf] (!%p315_p9)  ;;  %v540_v33 = vld [vmem:[%s1143_s3 + $0x8] sm:$0xff] (!%p315_p9)  ;;  %v541_v35 = vld [vmem:[%s1143_s3 + $0x10] sm:$0xff] (!%p315_p9)  ;;  %s650_s18 = sshll.u32 (!%p315_p9), %s349_s12, 4  ;;  %s638_s26 = scalar_lea.sflag (!%p315_p9), [#allocation3], %s348_s30  ;;  %s1100_s18 = int_to_ptr.vmem [resolvable:$true] %s650_s18 }
  0x13   : > { %785 = vmatprep.subr.bf16.mxu1 (!%p315_p9), %v909_v3  ;;  %v539_v32 = vld [vmem:[%s1143_s3] sm:$0xff] (!%p315_p9)  ;;  %v542_v36 = vld [vmem:[%s1143_s3 + $0x18] sm:$0xff] (!%p315_p9) }
  0x14   : > { %781 = vmatpush3.bf16.msra.mxu0 (!%p315_p9), %v780_v11  ;;  %530 = vperm.xlu0 (!%p315_p9), %843, %v527_v15   ;;  %v795_v34 = vpack.c.bf16 (!%p315_p9), %v540_v33, %v539_v32  ;;  %v798_v37 = vpack.c.bf16 (!%p315_p9), %v542_v36, %v541_v35  ;;  %v616_v38 = vld [vmem:[%s1148_s8] sm:$0xf] (!%p315_p9) }
  0x15   : > { %s351_s28 = scalar_select %p350_p10, %s990_s17, 1  ;;  %794 = vmatprep.subr.bf16.mxu0 %v909_v3  ;;  %619 = vperm.xlu1 %844, %v616_v38   ;;  %v534_v41 = vld [vmem:[%s1147_s7] sm:$0xf] }
  0x16   : > { %787 = vmatpush3.bf16.msra.mxu1 %v786_v16  ;;  %v623_v49 = vld [vmem:[%s1149_s9] sm:$0xf]  ;;  %s913_s17 = smov [#allocation2]  }
  0x17   : > { %s709_s21 = sshll.u32 %s351_s28, 2  ;;  %788 = vmatprep.subr.bf16.mxu1 %v909_v3  ;;  %s849_s28 = sshll.u32 %s913_s17, 4  ;;  %s850_s28 = int_to_ptr.vmem [resolvable:$false] %s849_s28 }
  0x18   : > { %s353_s27 = scalar_lea.vmem %s1140_s0, %s709_s21  ;;  %s851_s29 = scalar_lea.vmem %s850_s28, 32 }
  0x19   : > { %v354_v17 = vld [vmem:[%s353_s27] sm:$0xf]  ;;  %s845_s27 = scalar_lea.vmem %s1100_s18, 16  ;;  %p852_p0 = scmp.lt.s32.totalorder %s1100_s18, %s850_s28 }
  0x1a   : > { %744 = vmatmul.mubr.msk.f32.vlgmr.msra.gmra.mrb[0].mxu0 %vm359_vm1, %v354_v17  ;;  %790 = vmatpush3.bf16.msra.mxu1 %v789_v20  ;;  %p846_p11 = scmp.ne.s32.totalorder %s1100_s18, %s845_s27  ;;  %p853_p1 = scmp.lt.s32.totalorder %s851_s29, %s845_s27 }
  0x1b   : > { %773 = vmatprep.mubr.msk.f32.mxu0 %vm910_vm0, %v911_v6  ;;  %791 = vmatprep.subr.bf16.mxu1 %v909_v3 }
  0x1c   : > { %796 = vmatpush3.bf16.msra.mxu0 %v795_v34  ;;  %p847_p12 = pnand %p846_p11, %p1007_p5  ;;  %p854_p2 = por %p853_p1, %p852_p0 }
  0x1d   : > { %797 = vmatprep.subr.bf16.mxu0 %v909_v3 }
  0x1e   : > { %793 = vmatpush3.bf16.msra.mxu1 %v792_v23  ;;  %p848_p13 = pneg %p847_p12 }
  0x20   : > { %799 = vmatpush3.bf16.msra.mxu0 %v798_v37  ;;  %p855_p3 = pnand %p854_p2, %p848_p13 }
  0x8f   : > { %v437_v24 = vpop.permute.xlu0 %436 }
  0x93   : > { %v531_v39 = vpop.permute.xlu0 %530 }
  0x94   : > { %v620_v47 = vpop.permute.xlu1 %619 }
  0xed   : > { %v429_v25 = vpop.f32.mrb[0].mxu0 }
  0xee   : > { %v439_v27 = vmul.f32 %v437_v24, %v429_v25  ;;  %v745_v28 = vpop.f32.mrb[1].mxu0 }
  0xf0   : > { %v441_v29 = vadd.f32 %v440_v26, %v439_v27 }
  0xf2   : > { %v443_v30 = vmul.f32 0.01, %v441_v29  ;;  %vm442_vm2 = vcmp.ge.f32.partialorder %v441_v29, 0.0 }
  0xf4   : > { %v444_v31 = vsel %vm442_vm2, %v441_v29, %v443_v30 }
  0xf5   : > { %763 = vmatmul.mubr.msk.f32.vlgmr.msra.gmra.mrb[0].mxu1 %vm453_vm3, %v444_v31 }
 0x1c8   : > { %v523_v40 = vpop.f32.mrb[0].mxu1 }
 0x1c9   : > { %v533_v42 = vmul.f32 %v531_v39, %v523_v40  ;;  %v764_v43 = vpop.f32.mrb[1].mxu1 }
 0x1cb   : > { %v535_v44 = vadd.f32 %v534_v41, %v533_v42 }
 0x1cd   : > { %vm536_vm4 = vcmp.ge.f32.partialorder %v535_v44, 0.0  ;;  %v537_v45 = vmul.f32 0.01, %v535_v44 }
 0x1cf   : > { %v538_v46 = vsel %vm536_vm4, %v535_v44, %v537_v45 }
 0x1d0   : > { %774 = vmatmul.mubr.msk.f32.vlgmr.msra.gmra.mrb[2].mxu0 %vm359_vm1, %v538_v46 }
 0x2a3   : > { %v612_v48 = vpop.f32.mrb[2].mxu0 }
 0x2a4   : > { %v622_v50 = vmul.f32 %v620_v47, %v612_v48  ;;  %v775_v51 = vpop.f32.mrb[3].mxu0 }
 0x2a6   : > { %v624_v52 = vadd.f32 %v623_v49, %v622_v50 }
 0x2a8   : > { %v626_v53 = vsel %vm625_vm5, %v624_v52, 0.0 }
 0x2a9   : > { %v627_v54 = vrot.slane %v626_v53, 4 }
 0x2ab   : > { %v628_v55 = vadd.f32 %v627_v54, %v626_v53 }
 0x2ad   : > { %v629_v56 = vrot.slane %v628_v55, 2 }
 0x2af   : > { %v630_v57 = vadd.f32 %v629_v56, %v628_v55 }
 0x2b1   : > { %v631_v58 = vrot.slane %v630_v57, 1 }
 0x2b3   : > { %v632_v59 = vadd.f32 %v631_v58, %v630_v57 }
 0x2b5   : > { %v634_v60 = vmul.f32 0.25, %v632_v59 }
 0x2b7   : > { %636 = vst.msk [vmem:[%s349_s12] sm:$0x1] %vm635_vm6, %v634_v60 }
 0x2b8   : > { %858 = shalt.err (!%p855_p3)
}
 0x2b9   : > { %s859_s30 = scalar_lea.hbm %s1098_s25, 16  ;;  %s863_s20 = scalar_lea.hbm %s1150_s10, 32 }
 0x2ba   : > { %p860_p4 = scmp.ne.s32.totalorder %s1098_s25, %s859_s30  ;;  %p864_p9 = scmp.lt.u32.totalorder %s1098_s25, %s1150_s10 }
 0x2bb   : > { %p865_p10 = scmp.lt.u32.totalorder %s863_s20, %s859_s30  ;;  %p867_p12 = scmp.lt.u32.totalorder %s859_s30, %s1098_s25 }
 0x2bc   : > { %p861_p7 = pnand %p860_p4, %p1007_p5 }
 0x2bd   : > { %p866_p11 = por %p865_p10, %p864_p9 }
 0x2be   : > { %p862_p8 = pneg %p861_p7 }
 0x2bf   : > { %p868_p13 = por %p867_p12, %p866_p11 }
 0x2c1   : > { %p869_p0 = pnand %p868_p13, %p862_p8 }
 0x2c3   : > { %872 = shalt.err (!%p869_p0)
}
 0x2c4   : > { %800 = dma.vmem_to_hbm [thread:$0]  (%p1007_p5), %s1100_s18, 16, %s1098_s25, %s638_s26  }
 0x2c5 PF: > { %p806_p1 = scmp.ge.s32.totalorder %s907_s16, 2  ;;  %s662_s27 = sand.u32 1, %s895_s13  }
 0x2c6   : > { %s663_s28 = scalar_lea.sflag [#allocation3], %s662_s27 }
 0x2c7   : > { %p803_p2 = pnand %p806_p1, %p1011_p6 }
 0x2c9   : > { %890 = dma.done.wait (!%p803_p2), %s663_s28, 16  }
 0x2ca   : > { %892 = vsyncadd (!%p803_p2), %s663_s28, 4294967280  ;;  %p20_p3 = scmp.ge.s32.totalorder %s994_s19, 4   ;;  %s1153_s13 = smov %s899_s14 }
 0x2cb   : > { %s1154_s14 = smov %s903_s15  ;;  %s1155_s15 = smov %s1005_s22 }
 0x2cc   : > { %s1156_s16 = smov %s994_s19  ;;  %22 = sbr.rel (!%p20_p3) target bundleno = 3 (0x3), region = 95 }
 0x2d3   :  { %667 = vsyncpa [#allocation3], 1 }
 0x2d4   :  { %669 = vsyncpa [#allocation3 + $0x1], 1 }

</bundles_post_ra>
